<compile_context>
chip_gen: v5e
topology: v5e:2x2
jax: 0.10.0
libtpu: 0.0.40
codegen_flags: <defaults>
</compile_context>

<pallas_src>
import functools

import jax
import jax.numpy as jnp
from jax.experimental import pallas as pl
from jax.experimental.pallas import tpu as pltpu

_LANE = 128
_SUBLANE = 8


def _round_up(v, m):
    return ((v + m - 1) // m) * m


def _int_pow(x, n):
    """x ** n for a static positive integer n via repeated VPU multiplies."""
    assert n >= 1
    result = None
    base = x
    while n:
        if n & 1:
            result = base if result is None else result * base
        n >>= 1
        if n:
            base = base * base
    return result


def _gem_kernel_dynamic(p_ref, x_ref, o_ref, *, eps):
    # p_ref: SMEM (1,) f32 learnable parameter (scalar prefetch)
    # x_ref: VMEM (tile_r, H*W);  o_ref: VMEM (tile_r, 1)
    p = p_ref[0]
    inv_p = 1.0 / p                                    # hoisted scalar reciprocal
    x = jnp.maximum(x_ref[...].astype(jnp.float32), eps)   # clamp(min=eps)
    xp = jnp.exp(p * jnp.log(x))                       # x ** p (x >= eps > 0)
    m = jnp.mean(xp, axis=-1, keepdims=True)           # avg_pool2d over full (H, W)
    o_ref[...] = jnp.exp(jnp.log(m) * inv_p).astype(o_ref.dtype)   # ** (1/p)


def _gem_kernel_static(x_ref, o_ref, *, eps, p):
    # Static-p fast path: x ** p on the VPU when p is a small positive integer
    # (no per-element EUP log/exp); the (1/p) root is per-row only.
    x = jnp.maximum(x_ref[...].astype(jnp.float32), eps)
    p_int = int(p)
    if float(p_int) == float(p) and 1 <= p_int <= 16:
        xp = _int_pow(x, p_int)
    else:
        xp = jnp.exp(p * jnp.log(x))
    m = jnp.mean(xp, axis=-1, keepdims=True)
    if float(p) == 1.0:
        out = m
    else:
        out = jnp.exp(jnp.log(m) * (1.0 / float(p)))
    o_ref[...] = out.astype(o_ref.dtype)


def _vmem_budget_bytes():
    # Generation-aware cap: ~70% of physical VMEM (v5e/v6e: 128 MiB,
    # v7x: 64 MiB per TensorCore).  Fall back to the smallest (v7x) value.
    try:
        cap = int(pltpu.get_tpu_info().vmem_capacity_bytes)
    except Exception:
        cap = 64 * 1024 * 1024
    return (cap * 7) // 10


def _pick_tile_r(rows, padded_cols, itemsize, vmem_budget):
    # Per-row VMEM cost with lane padding: double-buffered input tile in the
    # input dtype plus ~3 f32 copies for the upcast / pow temporaries.
    per_row_vmem = padded_cols * (2 * itemsize + 3 * 4)
    # Target ~4 MiB of (padded) input DMA per grid step ...
    target = (4 * 1024 * 1024) // max(1, padded_cols * itemsize)
    # ... bounded by the VMEM budget (4 MiB headroom for output / stack).
    fit = max(_SUBLANE, (vmem_budget - (4 << 20)) // per_row_vmem)
    tile_r = min(target, fit)
    # Keep the "parallel" grid >= ~8 steps when possible (megacore sharding on
    # v7x, pipeline ramp), but never shrink a step below ~1 MiB of padded DMA.
    min_rows_1mb = (1024 * 1024) // max(1, padded_cols * itemsize)
    rows_8_steps = _round_up(pl.cdiv(rows, 8), _SUBLANE)
    tile_r = min(tile_r, max(min_rows_1mb, rows_8_steps))
    tile_r = max(_SUBLANE, (tile_r // _SUBLANE) * _SUBLANE)
    tile_r = min(tile_r, _round_up(rows, _SUBLANE))
    return tile_r


def gem(x, p, eps=1e-6):
    """GeM pooling.  x: (N, C, H, W) -> (N, C, 1, 1).

    `p` may be a traced scalar/array (learnable parameter, scalar-prefetch
    path) or a static Python number (frozen inference value, VPU fast path).
    """
    N, C, H, W = x.shape
    rows, cols = N * C, H * W
    x2 = x.reshape(rows, cols)

    itemsize = jnp.dtype(x.dtype).itemsize
    padded_cols = _round_up(cols, _LANE)
    vmem_budget = _vmem_budget_bytes()
    tile_r = _pick_tile_r(rows, padded_cols, itemsize, vmem_budget)
    grid = (pl.cdiv(rows, tile_r),)

    # Explicit scoped-VMEM limit from the *padded* tile working set, clamped
    # to the generation-aware budget (never exceeds physical VMEM).
    tile_vmem = tile_r * padded_cols * (2 * itemsize + 3 * 4) + (4 << 20)
    vmem_limit = int(min(vmem_budget, max(16 << 20, tile_vmem)))

    static_p = None
    if isinstance(p, (int, float)) and not isinstance(p, bool):
        static_p = float(p)
    is_int_p = (static_p is not None and float(int(static_p)) == static_p
                and 1 <= int(static_p) <= 16)

    cost = pl.CostEstimate(
        flops=3 * rows * cols + 4 * rows,
        transcendentals=(2 * rows if is_int_p else 2 * rows * cols + 2 * rows),
        bytes_accessed=rows * cols * itemsize + rows * itemsize,
    )
    compiler_params = pltpu.CompilerParams(
        dimension_semantics=("parallel",),
        vmem_limit_bytes=vmem_limit,
    )
    out_shape = jax.ShapeDtypeStruct((rows, 1), x.dtype)

    if static_p is not None:
        out = pl.pallas_call(
            functools.partial(_gem_kernel_static, eps=eps, p=static_p),
            out_shape=out_shape,
            grid_spec=pltpu.PrefetchScalarGridSpec(
                num_scalar_prefetch=0,
                grid=grid,
                in_specs=[pl.BlockSpec((tile_r, cols), lambda i: (i, 0))],
                out_specs=pl.BlockSpec((tile_r, 1), lambda i: (i, 0)),
            ),
            compiler_params=compiler_params,
            cost_estimate=cost,
        )(x2)
    else:
        p_arr = jnp.asarray(p, dtype=jnp.float32).reshape(1)
        out = pl.pallas_call(
            functools.partial(_gem_kernel_dynamic, eps=eps),
            out_shape=out_shape,
            grid_spec=pltpu.PrefetchScalarGridSpec(
                num_scalar_prefetch=1,                 # p lands in SMEM
                grid=grid,
                in_specs=[pl.BlockSpec((tile_r, cols), lambda i, p_ref: (i, 0))],
                out_specs=pl.BlockSpec((tile_r, 1), lambda i, p_ref: (i, 0)),
            ),
            compiler_params=compiler_params,
            cost_estimate=cost,
        )(p_arr, x2)

    return out.reshape(N, C, 1, 1)


def gem_reference(x, p, eps=1e-6):
    """Pure-JAX reference matching the PyTorch _gem."""
    xc = jnp.clip(x, eps)
    pooled = jnp.mean(xc ** p, axis=(-2, -1), keepdims=True)
    return pooled ** (1.0 / p)


if __name__ == "__main__":
    key = jax.random.PRNGKey(0)
    eps = 1e-6

    # Case 1: module default — learnable p initialized to ones(1) * 3 (traced).
    N, C, H, W = 2, 4, 16, 16
    x = jax.random.normal(key, (N, C, H, W), dtype=jnp.float32)
    p = jnp.ones((1,), dtype=jnp.float32) * 3.0
    out = jax.block_until_ready(gem(x, p, eps))
    ref = gem_reference(x, p[0], eps)
    assert out.shape == (N, C, 1, 1), out.shape
    assert jnp.allclose(out, ref, rtol=1e-4, atol=1e-6), float(jnp.max(jnp.abs(out - ref)))

    # Case 2: 7x7 head with a multi-step grid and ragged last row-tile (traced p).
    x2 = jax.random.normal(jax.random.PRNGKey(1), (2, 1100, 7, 7), dtype=jnp.float32)
    out2 = jax.block_until_ready(gem(x2, p, eps))
    ref2 = gem_reference(x2, p[0], eps)
    assert out2.shape == (2, 1100, 1, 1), out2.shape
    assert jnp.allclose(out2, ref2, rtol=1e-4, atol=1e-6), float(jnp.max(jnp.abs(out2 - ref2)))

    # Case 3: static (frozen) p=3 -> pure-VPU x**p fast path.
    out3 = jax.block_until_ready(gem(x, 3.0, eps))
    ref3 = gem_reference(x, 3.0, eps)
    assert jnp.allclose(out3, ref3, rtol=1e-4, atol=1e-6), float(jnp.max(jnp.abs(out3 - ref3)))

    print("KERNEL_OK")
</pallas_src>

<mosaic_0001>
module attributes {stable_mosaic.version = 11 : i64} {
  func.func @_gem_kernel_dynamic(%arg0: i32, %arg1: memref<1xf32, #tpu.memory_space<smem>>, %arg2: memref<8x256xf32, #tpu.memory_space<vmem>>, %arg3: memref<8x1xf32, #tpu.memory_space<vmem>>) attributes {dimension_semantics = [#tpu.dimension_semantics<parallel>], iteration_bounds = array<i64: 1>, scalar_prefetch = 1 : i64, scratch_operands = 0 : i64, tpu.core_type = #tpu.core_type<tc>, window_params = [{transform_indices = @transform_0, window_bounds = array<i64: 8, 256>}, {transform_indices = @transform_1, window_bounds = array<i64: 8, 1>}]} {
    %c0 = arith.constant 0 : index
    %0 = memref.load %arg1[%c0] : memref<1xf32, #tpu.memory_space<smem>>
    %cst = arith.constant 1.000000e+00 : f32
    %1 = arith.divf %cst, %0 : f32
    %c0_0 = arith.constant 0 : index
    %c0_1 = arith.constant 0 : index
    %2 = vector.load %arg2[%c0_0, %c0_1] : memref<8x256xf32, #tpu.memory_space<vmem>>, vector<8x256xf32>
    %cst_2 = arith.constant 9.99999997E-7 : f32
    %3 = vector.broadcast %cst_2 : f32 to vector<8x256xf32>
    %4 = arith.maximumf %2, %3 : vector<8x256xf32>
    %5 = math.log %4 : vector<8x256xf32>
    %6 = vector.broadcast %0 : f32 to vector<8x256xf32>
    %7 = arith.mulf %6, %5 : vector<8x256xf32>
    %8 = math.exp %7 : vector<8x256xf32>
    %cst_3 = arith.constant dense<0.000000e+00> : vector<8xf32>
    %9 = vector.multi_reduction <add>, %8, %cst_3 [1] : vector<8x256xf32> to vector<8xf32>
    %10 = vector.shape_cast %9 : vector<8xf32> to vector<8x1xf32>
    %cst_4 = arith.constant 2.560000e+02 : f32
    %11 = vector.broadcast %cst_4 : f32 to vector<8x1xf32>
    %12 = arith.divf %10, %11 : vector<8x1xf32>
    %13 = math.log %12 : vector<8x1xf32>
    %14 = vector.broadcast %1 : f32 to vector<8x1xf32>
    %15 = arith.mulf %13, %14 : vector<8x1xf32>
    %16 = math.exp %15 : vector<8x1xf32>
    %c0_5 = arith.constant 0 : index
    %c0_6 = arith.constant 0 : index
    %17 = vector.load %arg3[%c0_5, %c0_6] : memref<8x1xf32, #tpu.memory_space<vmem>>, vector<8x1xf32>
    tpu.vector_store %arg3[%c0_5, %c0_6], %16 {strides = array<i32>} : memref<8x1xf32, #tpu.memory_space<vmem>>, vector<8x1xf32>,
    return
  }
  func.func @transform_0(%arg0: i32, %arg1: memref<1xf32, #tpu.memory_space<smem>>) -> (i32, i32) {
    %c0_i32 = arith.constant 0 : i32
    %c0_i32_0 = arith.constant 0 : i32
    return %arg0, %c0_i32 : i32, i32
  }
  func.func @transform_1(%arg0: i32, %arg1: memref<1xf32, #tpu.memory_space<smem>>) -> (i32, i32) {
    %c0_i32 = arith.constant 0 : i32
    %c0_i32_0 = arith.constant 0 : i32
    return %arg0, %c0_i32 : i32, i32
  }
}

</mosaic_0001>

<bundles_post_ra>
// kernel: tpu_custom_call.1
= control target key start
LH: loop header
LB: loop body
LE: loop exit
PB: predicated region body
PF: predicated region fallthrough
CT: control target
= control target key end

     0   :  { %8 = vsyncpa [#allocation5], 0  ;;  %s126_s12 = smov [#allocation4]   ;;  %s152_s0 = inlined_call_operand.<no memory space> [shape: f32[1], index: 0, kind: input, shape index: {}]   ;;  %s153_s1 = inlined_call_operand.hbm [shape: f32[8,256], index: 1, kind: input, shape index: {}]   ;;  %s154_s2 = inlined_call_operand.vmem [shape: f32[8,1], index: 2, kind: output, shape index: {}]  }
   0x1   :  { %s14_s11 = sshll.u32 %s153_s1, 4  ;;  %s16_s13 = sshll.u32 %s126_s12, 4  ;;  %s15_s11 = int_to_ptr.hbm [resolvable:$true] %s14_s11  ;;  %s17_s13 = int_to_ptr.vmem [resolvable:$true] %s16_s13 }
   0x2   :  { %19 = dma.hbm_to_vmem [thread:$0]  %s15_s11, 256, %s17_s13, [#allocation5]  }
   0x3   :  { %124 = dma.done.wait [#allocation5], 256  }
   0x4   :  { %125 = vsyncadd [#allocation5], 4294967040  ;;  %v25_v0 = vstv %s152_s0  ;;  %v41_v2 = vld [vmem:[#allocation4] sm:$0xff]  ;;  %v42_v3 = vld [vmem:[#allocation4 + $0x8] sm:$0xff]  ;;  %v127_v26 = vmov 256.0   ;;  %vm73_vm5 = vcmask 7168  }
   0x5   :  { %84 = vrcp.f32 %v25_v0  ;;  %v43_v4 = vmax.f32 %v41_v2, 1e-06  ;;  %v44_v5 = vmax.f32 %v42_v3, 1e-06  ;;  %vm31_vm0 = vweird.f32 %v25_v0 }
   0x6   :  { %v37_v7 = vand.u32 2147483648, %v25_v0  ;;  %v35_v9 = vand.u32 2147483647, %v25_v0 }
   0x7   :  { %86 = vlog2.f32 %v43_v4 }
   0x8   :  { %88 = vlog2.f32 %v44_v5  ;;  %v38_v11 = vor.u32 1.1754944e-38, %v37_v7  ;;  %vm36_vm3 = vcmp.eq.f32.partialorder %v35_v9, 8.507059e+37 }
   0xb   :  { %v85_v1 = vpop.eup %84 }
   0xc   :  { %v27_v6 = vmul.f32 %v85_v1, %v25_v0  ;;  %vm32_vm1 = vweird.f32 %v85_v1 }
   0xd   :  { %vm33_vm2 = vmor %vm31_vm0, %vm32_vm1  ;;  %v87_v13 = vpop.eup %86 }
   0xe   :  { %v28_v8 = vsub.f32 1.0, %v27_v6  ;;  %v89_v15 = vpop.eup %88  ;;  %v46_v16 = vmul.f32 0.6931472, %v87_v13 }
   0xf   :  { %v48_v18 = vmul.f32 0.6931472, %v89_v15 }
  0x10   :  { %v29_v10 = vmul.f32 %v85_v1, %v28_v8  ;;  %v50_v19 = vmul.f32 %v46_v16, %v25_v0 }
  0x11   :  { %v51_v20 = vmul.f32 %v48_v18, %v25_v0 }
  0x12   :  { %v30_v12 = vadd.f32 %v85_v1, %v29_v10  ;;  %v52_v21 = vmul.f32 1.442695, %v50_v19 }
  0x13   :  { %v54_v22 = vmul.f32 1.442695, %v51_v20 }
  0x14   :  { %v34_v14 = vsel %vm33_vm2, %v85_v1, %v30_v12  ;;  %90 = vpow2.f32 %v52_v21 }
  0x15   :  { %v39_v17 = vsel %vm36_vm3, %v38_v11, %v34_v14  ;;  %92 = vpow2.f32 %v54_v22 }
  0x16   :  { %80 = vpush %v39_v17  ;;  %94 = vrcp.f32 %v127_v26 }
  0x1a   :  { %v91_v23 = vpop.eup %90 }
  0x1b   :  { %v93_v24 = vpop.eup %92 }
  0x1c   :  { %v56_v25 = vadd.f32 %v93_v24, %v91_v23  ;;  %v95_v27 = vpop.eup %94 }
  0x1d   :  { %v60_v28 = vmul.f32 256.0, %v95_v27  ;;  %vm64_vm4 = vweird.f32 %v95_v27 }
  0x1e   :  { %57 = vadd.xlane.f32.xlu0 %v56_v25 }
  0x1f   :  { %v61_v29 = vsub.f32 1.0, %v60_v28 }
  0x21   :  { %v62_v30 = vmul.f32 %v95_v27, %v61_v29 }
  0x23   :  { %v63_v31 = vadd.f32 %v95_v27, %v62_v30 }
  0x25   :  { %v65_v32 = vsel %vm64_vm4, %v95_v27, %v63_v31 }
  0x47   :  { %s81_s0 = spop %80 }
  0x48   :  { %v69_v36 = vstv %s81_s0 }
  0x91   :  { %v58_v33 = vpop.xlane.xlu0 %57 }
  0x92   :  { %v66_v34 = vmul.f32 %v65_v32, %v58_v33 }
  0x94   :  { %96 = vlog2.f32 %v66_v34 }
  0x9a   :  { %v97_v35 = vpop.eup %96 }
  0x9b   :  { %v68_v37 = vmul.f32 0.6931472, %v97_v35 }
  0x9d   :  { %v70_v38 = vmul.f32 %v69_v36, %v68_v37 }
  0x9f   :  { %v71_v39 = vmul.f32 1.442695, %v70_v38 }
  0xa1   :  { %98 = vpow2.f32 %v71_v39 }
  0xa7   :  { %v99_v40 = vpop.eup %98 }
  0xa8   :  { %74 = vst.msk [vmem:[%s154_s2] sm:$0xff] %vm73_vm5, %v99_v40 }
  0xa9   :  { %79 = vsyncpa [#allocation5], 1 }

</bundles_post_ra>
